<compile_context>
chip_gen: v6e
topology: v6e:2x2x1
jax: 0.10.0
libtpu: 0.0.40
codegen_flags: <defaults>
</compile_context>

<pallas_src>
from functools import partial

import jax
import jax.numpy as jnp
from jax import lax
from jax.experimental import pallas as pl
from jax.experimental.pallas import tpu as pltpu


# --------------------------------------------------------------------------
# pass 1: 1x1 conv projections (+ W folded into the value path)
# --------------------------------------------------------------------------
def _proj_kernel(x_ref, wk_ref, bk_ref, wv_ref, bv_ref, ww_ref,
                 qk_ref, v_ref, qkb_ref, veff_ref, *, q_prescale):
    x = x_ref[...]                                                    # (C, tl) f32

    qk = jnp.maximum(
        jnp.dot(wk_ref[...], x, preferred_element_type=jnp.float32) + bk_ref[...],
        0.0)                                                          # (Ck, tl)
    qk_ref[...] = qk                                                  # f32 viz output
    # Ck^-0.25 applied to BOTH q and k (they are the same tensor) => Ck^-0.5 scores.
    qkb_ref[...] = (qk * q_prescale).astype(jnp.bfloat16)

    v = jnp.dot(wv_ref[...], x, preferred_element_type=jnp.float32) + bv_ref[...]
    v_ref[...] = v                                                    # (Cv, tl) f32 viz
    # W conv folded into the value path: veff = ww @ v  (Cout, tl)
    veff_ref[...] = jnp.dot(
        ww_ref[...], v, preferred_element_type=jnp.float32).astype(jnp.bfloat16)


# --------------------------------------------------------------------------
# pass 2: attention (per query tile); W already folded into veff
# --------------------------------------------------------------------------
def _attn_kernel(q_ref, k_ref, veff_ref, bw_ref, out_ref, *, valid_len):
    q = q_ref[...]                                                    # (Ck, tq) bf16
    k = k_ref[...]                                                    # (Ck, Lp) bf16

    # scores (tq, Lp): contract the shared Ck axis directly (no q.T relayout);
    # f32 accumulation on the MXU.
    s = lax.dot_general(q, k, (((0,), (0,)), ((), ())),
                        preferred_element_type=jnp.float32)

    if valid_len is not None:  # mask padded key columns out of the softmax
        key_idx = lax.broadcasted_iota(jnp.int32, s.shape, 1)
        s = jnp.where(key_idx < valid_len, s, jnp.finfo(jnp.float32).min)

    # softmax over the key axis; element-wise math kept in f32 (v5e-safe)
    s = s - jnp.max(s, axis=-1, keepdims=True)
    e = jnp.exp(s)
    inv_den = pl.reciprocal(jnp.sum(e, axis=-1, keepdims=True), approx=False)
    p = (e * inv_den).astype(jnp.bfloat16)                            # (tq, Lp)

    # context with W folded in: (Cout, Lp) x (tq, Lp) contracted over Lp
    ctx = lax.dot_general(veff_ref[...], p, (((1,), (1,)), ((), ())),
                          preferred_element_type=jnp.float32)         # (Cout, tq)
    out_ref[...] = ctx + bw_ref[...]


# --------------------------------------------------------------------------
# wrapper
# --------------------------------------------------------------------------
def _largest_lane_tile(total, cap, quantum=128):
    """Largest multiple of `quantum` that divides `total` and is <= cap."""
    assert total % quantum == 0
    best = quantum
    t = quantum
    cap = min(cap, total)
    while t <= cap:
        if total % t == 0:
            best = t
        t += quantum
    return best


def self_attention_block_forward(x_nchw, params, key_channels, *,
                                 tile_q=256, tile_l=2048):
    """x_nchw: (N, C, H, W) float32.  Returns the 5-tuple of the PyTorch forward."""
    N, C, H, W = x_nchw.shape
    L = H * W
    Ck = params["wk"].shape[0]
    Cv = params["wv"].shape[0]
    Cout = params["ww"].shape[0]

    # pad the lane axis to a multiple of 128 (lane-dense stores, no tq=L fallback)
    Lp = ((L + 127) // 128) * 128
    x_ncl = x_nchw.reshape(N, C, L)                 # free reshape, no transpose
    if Lp != L:
        x_ncl = jnp.pad(x_ncl, ((0, 0), (0, 0), (0, Lp - L)))

    # ---------------- pass 1: projections ----------------
    tl = _largest_lane_tile(Lp, tile_l)
    nl = Lp // tl
    q_prescale = float(key_channels) ** (-0.25)

    proj_cost = pl.CostEstimate(
        flops=2 * N * Lp * (C * (Ck + Cv) + Cv * Cout),
        transcendentals=0,
        bytes_accessed=int(4 * N * Lp * (C + Ck + Cv) + 2 * N * Lp * (Ck + Cout)
                           + 4 * (C * (Ck + Cv) + Cout * Cv + Ck + Cv)),
    )
    qk_f32, v_f32, qk_bf, veff_bf = pl.pallas_call(
        partial(_proj_kernel, q_prescale=q_prescale),
        grid=(N, nl),
        in_specs=[
            pl.BlockSpec((None, C, tl), lambda b, l: (b, 0, l)),   # x (batch squeezed)
            pl.BlockSpec((Ck, C), lambda b, l: (0, 0)),            # f_key weight (BN folded)
            pl.BlockSpec((Ck, 1), lambda b, l: (0, 0)),            # f_key bias
            pl.BlockSpec((Cv, C), lambda b, l: (0, 0)),            # f_value weight
            pl.BlockSpec((Cv, 1), lambda b, l: (0, 0)),            # f_value bias
            pl.BlockSpec((Cout, Cv), lambda b, l: (0, 0)),         # W weight (folded here)
        ],
        out_specs=[
            pl.BlockSpec((None, Ck, tl), lambda b, l: (b, 0, l)),    # qk f32 (viz)
            pl.BlockSpec((None, Cv, tl), lambda b, l: (b, 0, l)),    # v  f32 (viz)
            pl.BlockSpec((None, Ck, tl), lambda b, l: (b, 0, l)),    # qk bf16 (attn)
            pl.BlockSpec((None, Cout, tl), lambda b, l: (b, 0, l)),  # W@v bf16 (attn)
        ],
        out_shape=(jax.ShapeDtypeStruct((N, Ck, Lp), jnp.float32),
                   jax.ShapeDtypeStruct((N, Cv, Lp), jnp.float32),
                   jax.ShapeDtypeStruct((N, Ck, Lp), jnp.bfloat16),
                   jax.ShapeDtypeStruct((N, Cout, Lp), jnp.bfloat16)),
        compiler_params=pltpu.CompilerParams(
            dimension_semantics=("parallel", "parallel")),
        cost_estimate=proj_cost,
    )(x_ncl, params["wk"], params["bk"], params["wv"], params["bv"], params["ww"])

    # ---------------- pass 2: attention ----------------
    tq = _largest_lane_tile(Lp, tile_q)
    nq = Lp // tq
    valid_len = None if Lp == L else L

    # Explicit VMEM budget: double-buffered blocks + softmax intermediates,
    # clamped to stay within v7x's 64 MiB physical VMEM.
    blk_bytes = 2 * (Ck * tq * 2 + Ck * Lp * 2 + Cout * Lp * 2
                     + Cout * tq * 4 + Cout * 4)
    interm_bytes = tq * Lp * (4 + 4 + 2)            # s, e (f32) + p (bf16)
    vmem_limit = int(min(max(blk_bytes + interm_bytes + (4 << 20), 32 << 20),
                         64 << 20))

    attn_cost = pl.CostEstimate(
        flops=2 * N * Lp * Lp * (Ck + Cout),
        transcendentals=N * Lp * Lp,
        bytes_accessed=int(2 * N * Lp * (2 * Ck + Cout) + 4 * N * Lp * Cout
                           + 4 * Cout),
    )

    out_ncl = pl.pallas_call(
        partial(_attn_kernel, valid_len=valid_len),
        # q is the trailing/fastest grid axis so the constant-index K/Veff
        # blocks stay resident across query tiles (no re-DMA per step).
        grid=(N, nq),
        in_specs=[
            pl.BlockSpec((None, Ck, tq), lambda b, q: (b, 0, q)),    # query tile
            pl.BlockSpec((None, Ck, Lp), lambda b, q: (b, 0, 0)),    # all keys
            pl.BlockSpec((None, Cout, Lp), lambda b, q: (b, 0, 0)),  # W-folded values
            pl.BlockSpec((Cout, 1), lambda b, q: (0, 0)),            # W bias
        ],
        out_specs=pl.BlockSpec((None, Cout, tq), lambda b, q: (b, 0, q)),
        out_shape=jax.ShapeDtypeStruct((N, Cout, Lp), jnp.float32),
        compiler_params=pltpu.CompilerParams(
            dimension_semantics=("parallel", "parallel"),
            vmem_limit_bytes=vmem_limit),
        cost_estimate=attn_cost,
    )(qk_bf, qk_bf, veff_bf, params["bw"])

    # slice off lane padding (no-op when Lp == L), reshape back to NCHW
    output = out_ncl[:, :, :L].reshape(N, Cout, H, W)
    vis_query = qk_f32[:, :, :L].reshape(N, Ck, H, W)
    vis_key = vis_query                   # f_query IS f_key -> identical values
    vis_value = v_f32[:, :, :L].reshape(N, Cv, H, W)
    return output, vis_query, vis_key, vis_value, None


# --------------------------------------------------------------------------
# parameter prep + pure-JAX reference
# --------------------------------------------------------------------------
def _fold_conv_bn(w_conv, b_conv, gamma, beta, mean, var, eps=1e-5):
    """Fold eval-mode BatchNorm into a 1x1 conv.  w_conv: (Cout, Cin)."""
    scale = gamma / jnp.sqrt(var + eps)
    w_eff = w_conv * scale[:, None]                # (Cout, Cin)  for W @ x
    b_eff = (b_conv - mean) * scale + beta         # (Cout,)
    return w_eff, b_eff[:, None]                   # bias as (Cout, 1)


def _reference(x_ncl, p, key_channels):
    qk = jnp.maximum(jnp.einsum("oc,ncl->nol", p["wk"], x_ncl) + p["bk"][None], 0.0)
    v = jnp.einsum("oc,ncl->nol", p["wv"], x_ncl) + p["bv"][None]
    s = jnp.einsum("nci,ncj->nij", qk, qk) * float(key_channels) ** (-0.5)
    a = jax.nn.softmax(s, axis=-1)
    ctx = jnp.einsum("nij,ncj->nci", a, v)
    out = jnp.einsum("oc,ncl->nol", p["ww"], ctx) + p["bw"][None]
    return out, qk, v


def _make_params(key, C, Ck, Cv, Cout):
    ks = jax.random.split(key, 11)
    # f_key: Conv2d(C, Ck, 1) + BatchNorm2d(Ck)  (eval-mode, folded)
    wk_conv = 0.2 * jax.random.normal(ks[0], (Ck, C), jnp.float32)
    bk_conv = 0.1 * jax.random.normal(ks[1], (Ck,), jnp.float32)
    gamma_k = 1.0 + 0.1 * jax.random.normal(ks[2], (Ck,), jnp.float32)
    beta_k = 0.1 * jax.random.normal(ks[3], (Ck,), jnp.float32)
    run_mean = 0.1 * jax.random.normal(ks[4], (Ck,), jnp.float32)
    run_var = 1.0 + 0.1 * jax.random.uniform(ks[5], (Ck,), jnp.float32)
    wk, bk = _fold_conv_bn(wk_conv, bk_conv, gamma_k, beta_k, run_mean, run_var)
    # f_value: Conv2d(C, Cv, 1)
    wv = 0.2 * jax.random.normal(ks[6], (Cv, C), jnp.float32)
    bv = 0.1 * jax.random.normal(ks[7], (Cv,), jnp.float32)[:, None]
    # W: Conv2d(Cv, Cout, 1).  (PyTorch zero-inits this; random here so the
    # attention path actually contributes to the output.)
    ww = 0.2 * jax.random.normal(ks[8], (Cout, Cv), jnp.float32)
    bw = 0.1 * jax.random.normal(ks[9], (Cout,), jnp.float32)[:, None]
    return dict(wk=wk, bk=bk, wv=wv, bv=bv, ww=ww, bw=bw)


def _check_case(key, N, C, H, W, Ck, Cv, Cout):
    kx, kp = jax.random.split(key)
    x = jax.random.normal(kx, (N, C, H, W), jnp.float32)
    params = _make_params(kp, C, Ck, Cv, Cout)

    out, vq, vk, vv, sim = self_attention_block_forward(x, params, key_channels=Ck)
    jax.block_until_ready(out)

    x_ncl = x.reshape(N, C, H * W)
    ref_out, ref_qk, ref_v = _reference(x_ncl, params, Ck)

    assert jnp.allclose(vq, ref_qk.reshape(N, Ck, H, W), atol=1e-4, rtol=1e-4)
    assert jnp.allclose(vk, ref_qk.reshape(N, Ck, H, W), atol=1e-4, rtol=1e-4)
    assert jnp.allclose(vv, ref_v.reshape(N, Cv, H, W), atol=1e-4, rtol=1e-4)
    # bf16 operands on the O(L^2) matmuls -> looser tolerance on the output
    assert jnp.allclose(out, ref_out.reshape(N, Cout, H, W), atol=3e-2, rtol=3e-2)
    assert sim is None


if __name__ == "__main__":
    root = jax.random.PRNGKey(0)
    k1, k2 = jax.random.split(root)

    # primary case: L = 256 (multiple of 128, no padding path)
    _check_case(k1, N=2, C=32, H=16, W=16, Ck=16, Cv=16, Cout=32)
    # padded case: L = 144 -> padded to 256, key-mask path exercised
    _check_case(k2, N=1, C=32, H=12, W=12, Ck=16, Cv=16, Cout=32)

    print("KERNEL_OK")
</pallas_src>

<mosaic_0001>
module attributes {stable_mosaic.version = 11 : i64} {
  func.func @_proj_kernel(%arg0: i32, %arg1: i32, %arg2: memref<1x32x256xf32, #tpu.memory_space<vmem>>, %arg3: memref<16x32xf32, #tpu.memory_space<vmem>>, %arg4: memref<16x1xf32, #tpu.memory_space<vmem>>, %arg5: memref<16x32xf32, #tpu.memory_space<vmem>>, %arg6: memref<16x1xf32, #tpu.memory_space<vmem>>, %arg7: memref<32x16xf32, #tpu.memory_space<vmem>>, %arg8: memref<1x16x256xf32, #tpu.memory_space<vmem>>, %arg9: memref<1x16x256xf32, #tpu.memory_space<vmem>>, %arg10: memref<1x16x256xbf16, #tpu.memory_space<vmem>>, %arg11: memref<1x32x256xbf16, #tpu.memory_space<vmem>>) attributes {dimension_semantics = [#tpu.dimension_semantics<parallel>, #tpu.dimension_semantics<parallel>], iteration_bounds = array<i64: 2, 1>, scalar_prefetch = 0 : i64, scratch_operands = 0 : i64, tpu.core_type = #tpu.core_type<tc>, window_params = [{transform_indices = @transform_0, window_bounds = array<i64: 1, 32, 256>}, {pipeline_mode = #tpu.pipeline_mode<synchronous>, transform_indices = @transform_1, window_bounds = array<i64: 16, 32>}, {pipeline_mode = #tpu.pipeline_mode<synchronous>, transform_indices = @transform_2, window_bounds = array<i64: 16, 1>}, {pipeline_mode = #tpu.pipeline_mode<synchronous>, transform_indices = @transform_3, window_bounds = array<i64: 16, 32>}, {pipeline_mode = #tpu.pipeline_mode<synchronous>, transform_indices = @transform_4, window_bounds = array<i64: 16, 1>}, {pipeline_mode = #tpu.pipeline_mode<synchronous>, transform_indices = @transform_5, window_bounds = array<i64: 32, 16>}, {transform_indices = @transform_6, window_bounds = array<i64: 1, 16, 256>}, {transform_indices = @transform_7, window_bounds = array<i64: 1, 16, 256>}, {transform_indices = @transform_8, window_bounds = array<i64: 1, 16, 256>}, {transform_indices = @transform_9, window_bounds = array<i64: 1, 32, 256>}]} {
    %c0 = arith.constant 0 : index
    %c0_0 = arith.constant 0 : index
    %c0_1 = arith.constant 0 : index
    %0 = vector.load %arg2[%c0, %c0_0, %c0_1] : memref<1x32x256xf32, #tpu.memory_space<vmem>>, vector<1x32x256xf32>
    %1 = vector.shape_cast %0 : vector<1x32x256xf32> to vector<32x256xf32>
    %c0_2 = arith.constant 0 : index
    %c0_3 = arith.constant 0 : index
    %2 = vector.load %arg3[%c0_2, %c0_3] : memref<16x32xf32, #tpu.memory_space<vmem>>, vector<16x32xf32>
    %cst = arith.constant dense<0.000000e+00> : vector<16x256xf32>
    %3 = tpu.matmul %2, %1, %cst {dimension_numbers = #tpu.dot_dimension_numbers<[1], [0], [0], [1], [0, 0, 1, 1], [], []>} : vector<16x32xf32>, vector<32x256xf32>, vector<16x256xf32> -> vector<16x256xf32>
    %c0_4 = arith.constant 0 : index
    %c0_5 = arith.constant 0 : index
    %4 = vector.load %arg4[%c0_4, %c0_5] : memref<16x1xf32, #tpu.memory_space<vmem>>, vector<16x1xf32>
    %5 = vector.broadcast %4 : vector<16x1xf32> to vector<16x256xf32>
    %6 = arith.addf %3, %5 : vector<16x256xf32>
    %cst_6 = arith.constant 0.000000e+00 : f32
    %7 = vector.broadcast %cst_6 : f32 to vector<16x256xf32>
    %8 = arith.maximumf %6, %7 : vector<16x256xf32>
    %c0_7 = arith.constant 0 : index
    %c0_8 = arith.constant 0 : index
    %c0_9 = arith.constant 0 : index
    %9 = vector.load %arg8[%c0_7, %c0_8, %c0_9] : memref<1x16x256xf32, #tpu.memory_space<vmem>>, vector<1x16x256xf32>
    %10 = vector.shape_cast %9 : vector<1x16x256xf32> to vector<16x256xf32>
    %11 = vector.shape_cast %8 : vector<16x256xf32> to vector<1x16x256xf32>
    tpu.vector_store %arg8[%c0_7, %c0_8, %c0_9], %11 {strides = array<i32>} : memref<1x16x256xf32, #tpu.memory_space<vmem>>, vector<1x16x256xf32>,
    %cst_10 = arith.constant 5.000000e-01 : f32
    %12 = vector.broadcast %cst_10 : f32 to vector<16x256xf32>
    %13 = arith.mulf %8, %12 : vector<16x256xf32>
    %14 = arith.truncf %13 : vector<16x256xf32> to vector<16x256xbf16>
    %c0_11 = arith.constant 0 : index
    %c0_12 = arith.constant 0 : index
    %c0_13 = arith.constant 0 : index
    %15 = vector.load %arg10[%c0_11, %c0_12, %c0_13] : memref<1x16x256xbf16, #tpu.memory_space<vmem>>, vector<1x16x256xbf16>
    %16 = vector.shape_cast %15 : vector<1x16x256xbf16> to vector<16x256xbf16>
    %17 = vector.shape_cast %14 : vector<16x256xbf16> to vector<1x16x256xbf16>
    tpu.vector_store %arg10[%c0_11, %c0_12, %c0_13], %17 {strides = array<i32>} : memref<1x16x256xbf16, #tpu.memory_space<vmem>>, vector<1x16x256xbf16>,
    %c0_14 = arith.constant 0 : index
    %c0_15 = arith.constant 0 : index
    %18 = vector.load %arg5[%c0_14, %c0_15] : memref<16x32xf32, #tpu.memory_space<vmem>>, vector<16x32xf32>
    %cst_16 = arith.constant dense<0.000000e+00> : vector<16x256xf32>
    %19 = tpu.matmul %18, %1, %cst_16 {dimension_numbers = #tpu.dot_dimension_numbers<[1], [0], [0], [1], [0, 0, 1, 1], [], []>} : vector<16x32xf32>, vector<32x256xf32>, vector<16x256xf32> -> vector<16x256xf32>
    %c0_17 = arith.constant 0 : index
    %c0_18 = arith.constant 0 : index
    %20 = vector.load %arg6[%c0_17, %c0_18] : memref<16x1xf32, #tpu.memory_space<vmem>>, vector<16x1xf32>
    %21 = vector.broadcast %20 : vector<16x1xf32> to vector<16x256xf32>
    %22 = arith.addf %19, %21 : vector<16x256xf32>
    %c0_19 = arith.constant 0 : index
    %c0_20 = arith.constant 0 : index
    %c0_21 = arith.constant 0 : index
    %23 = vector.load %arg9[%c0_19, %c0_20, %c0_21] : memref<1x16x256xf32, #tpu.memory_space<vmem>>, vector<1x16x256xf32>
    %24 = vector.shape_cast %23 : vector<1x16x256xf32> to vector<16x256xf32>
    %25 = vector.shape_cast %22 : vector<16x256xf32> to vector<1x16x256xf32>
    tpu.vector_store %arg9[%c0_19, %c0_20, %c0_21], %25 {strides = array<i32>} : memref<1x16x256xf32, #tpu.memory_space<vmem>>, vector<1x16x256xf32>,
    %c0_22 = arith.constant 0 : index
    %c0_23 = arith.constant 0 : index
    %26 = vector.load %arg7[%c0_22, %c0_23] : memref<32x16xf32, #tpu.memory_space<vmem>>, vector<32x16xf32>
    %cst_24 = arith.constant dense<0.000000e+00> : vector<32x256xf32>
    %27 = tpu.matmul %26, %22, %cst_24 {dimension_numbers = #tpu.dot_dimension_numbers<[1], [0], [0], [1], [0, 0, 1, 1], [], []>} : vector<32x16xf32>, vector<16x256xf32>, vector<32x256xf32> -> vector<32x256xf32>
    %28 = arith.truncf %27 : vector<32x256xf32> to vector<32x256xbf16>
    %c0_25 = arith.constant 0 : index
    %c0_26 = arith.constant 0 : index
    %c0_27 = arith.constant 0 : index
    %29 = vector.load %arg11[%c0_25, %c0_26, %c0_27] : memref<1x32x256xbf16, #tpu.memory_space<vmem>>, vector<1x32x256xbf16>
    %30 = vector.shape_cast %29 : vector<1x32x256xbf16> to vector<32x256xbf16>
    %31 = vector.shape_cast %28 : vector<32x256xbf16> to vector<1x32x256xbf16>
    tpu.vector_store %arg11[%c0_25, %c0_26, %c0_27], %31 {strides = array<i32>} : memref<1x32x256xbf16, #tpu.memory_space<vmem>>, vector<1x32x256xbf16>,
    return
  }
  func.func @transform_0(%arg0: i32, %arg1: i32) -> (i32, i32, i32) {
    %c0_i32 = arith.constant 0 : i32
    %c0_i32_0 = arith.constant 0 : i32
    return %arg0, %c0_i32, %arg1 : i32, i32, i32
  }
  func.func @transform_1(%arg0: i32, %arg1: i32) -> (i32, i32) {
    %c0_i32 = arith.constant 0 : i32
    %c0_i32_0 = arith.constant 0 : i32
    %c0_i32_1 = arith.constant 0 : i32
    return %c0_i32, %c0_i32_0 : i32, i32
  }
  func.func @transform_2(%arg0: i32, %arg1: i32) -> (i32, i32) {
    %c0_i32 = arith.constant 0 : i32
    %c0_i32_0 = arith.constant 0 : i32
    %c0_i32_1 = arith.constant 0 : i32
    return %c0_i32, %c0_i32_0 : i32, i32
  }
  func.func @transform_3(%arg0: i32, %arg1: i32) -> (i32, i32) {
    %c0_i32 = arith.constant 0 : i32
    %c0_i32_0 = arith.constant 0 : i32
    %c0_i32_1 = arith.constant 0 : i32
    return %c0_i32, %c0_i32_0 : i32, i32
  }
  func.func @transform_4(%arg0: i32, %arg1: i32) -> (i32, i32) {
    %c0_i32 = arith.constant 0 : i32
    %c0_i32_0 = arith.constant 0 : i32
    %c0_i32_1 = arith.constant 0 : i32
    return %c0_i32, %c0_i32_0 : i32, i32
  }
  func.func @transform_5(%arg0: i32, %arg1: i32) -> (i32, i32) {
    %c0_i32 = arith.constant 0 : i32
    %c0_i32_0 = arith.constant 0 : i32
    %c0_i32_1 = arith.constant 0 : i32
    return %c0_i32, %c0_i32_0 : i32, i32
  }
  func.func @transform_6(%arg0: i32, %arg1: i32) -> (i32, i32, i32) {
    %c0_i32 = arith.constant 0 : i32
    %c0_i32_0 = arith.constant 0 : i32
    return %arg0, %c0_i32, %arg1 : i32, i32, i32
  }
  func.func @transform_7(%arg0: i32, %arg1: i32) -> (i32, i32, i32) {
    %c0_i32 = arith.constant 0 : i32
    %c0_i32_0 = arith.constant 0 : i32
    return %arg0, %c0_i32, %arg1 : i32, i32, i32
  }
  func.func @transform_8(%arg0: i32, %arg1: i32) -> (i32, i32, i32) {
    %c0_i32 = arith.constant 0 : i32
    %c0_i32_0 = arith.constant 0 : i32
    return %arg0, %c0_i32, %arg1 : i32, i32, i32
  }
  func.func @transform_9(%arg0: i32, %arg1: i32) -> (i32, i32, i32) {
    %c0_i32 = arith.constant 0 : i32
    %c0_i32_0 = arith.constant 0 : i32
    return %arg0, %c0_i32, %arg1 : i32, i32, i32
  }
}

</mosaic_0001>

<bundles_post_ra>
// kernel: tpu_custom_call.1
= control target key start
LH: loop header
LB: loop body
LE: loop exit
PB: predicated region body
PF: predicated region fallthrough
CT: control target
= control target key end

     0   :  { %s1778_s0 = inlined_call_operand.hbm [shape: f32[2,32,256], index: 0, kind: input, shape index: {}]   ;;  %s1779_s1 = inlined_call_operand.vmem [shape: f32[16,32], index: 1, kind: input, shape index: {}]   ;;  %s1780_s2 = inlined_call_operand.vmem [shape: f32[16,1], index: 2, kind: input, shape index: {}]   ;;  %s1781_s3 = inlined_call_operand.vmem [shape: f32[16,32], index: 3, kind: input, shape index: {}]   ;;  %s1782_s4 = inlined_call_operand.vmem [shape: f32[16,1], index: 4, kind: input, shape index: {}]   ;;  %s1783_s5 = inlined_call_operand.vmem [shape: f32[32,16], index: 5, kind: input, shape index: {}]   ;;  %s1784_s6 = inlined_call_operand.hbm [shape: f32[2,16,256], index: 6, kind: output, shape index: {0}]   ;;  %s1785_s7 = inlined_call_operand.hbm [shape: f32[2,16,256], index: 7, kind: output, shape index: {1}]   ;;  %s1786_s8 = inlined_call_operand.hbm [shape: bf16[2,16,256], index: 8, kind: output, shape index: {2}]   ;;  %s1787_s9 = inlined_call_operand.hbm [shape: bf16[2,32,256], index: 9, kind: output, shape index: {3}]  }
   0x1   :  { %1793 = sst [smem:[#allocation19_spill]] %s1778_s0 }
   0x2   :  { %1794 = sst [smem:[#allocation20_spill]] %s1779_s1 }
   0x3   :  { %1795 = sst [smem:[#allocation21_spill]] %s1780_s2 }
   0x4   :  { %15 = vsyncpa [#allocation3], 0 }
   0x5   :  { %17 = vsyncpa [#allocation3 + $0x1], 0 }
   0x6   :  { %18 = vsyncpa [#allocation4], 0 }
   0x7   :  { %20 = vsyncpa [#allocation4 + $0x1], 0 }
   0x8   :  { %21 = vsyncpa [#allocation7], 0 }
   0x9   :  { %23 = vsyncpa [#allocation7 + $0x1], 0 }
   0xa   :  { %24 = vsyncpa [#allocation10], 0 }
   0xb   :  { %26 = vsyncpa [#allocation10 + $0x1], 0  ;;  %s1447_s30 = smov 0   ;;  %s1449_s10 = smov 0  }
   0xc   :  { %s1451_s11 = smov 0   ;;  %s1453_s12 = smov 0  }
   0xd   :  { %s1455_s13 = smov 0   ;;  %s1457_s14 = smov 0  }
   0xe LB: > { %1796 = sst [smem:[#allocation15_spill]] %s1362_s30  ;;  %s1478_s15 = sadd.s32 4294967295, %s1382_s14   ;;  %s1382_s14 = sphi %s1457_s14, %s32_s14   ;;  %s1378_s13 = sphi %s1455_s13, %s1814_s13   ;;  %s1374_s12 = sphi %s1453_s12, %s1813_s12   ;;  %s1370_s11 = sphi %s1451_s11, %s1817_s11   ;;  %s1366_s10 = sphi %s1449_s10, %s1816_s10   ;;  %s1362_s30 = sphi %s1447_s30, %s1815_s30  }
   0xf   : > { %1797 = sst [smem:[#allocation16_spill]] %s1378_s13  ;;  %s1790_s16 = sadd.s32 4294967294, %s1382_s14  }
  0x10   : > { %s44_s17 = sadd.s32 1, %s1378_s13  ;;  %s53_s18 = sadd.s32 1, %s1370_s11 }
  0x11   : > { %p46_p0 = scmp.ge.s32.totalorder %s44_s17, 2  ;;  %p60_p1 = scmp.ne.s32.totalorder %s1370_s11, %s1366_s10 }
  0x12   : > { %p61_p2 = scmp.eq.s32.totalorder %s1382_s14, 0  ;;  %p66_p3 = scmp.ne.s32.totalorder %s1366_s10, %s1362_s30 }
  0x13   : > { %s1819_s17 = smov (%p46_p0, %s44_s17), 0  ;;  %p67_p5 = scmp.eq.s32.totalorder %s1478_s15, 0 }
  0x14   : > { %1798 = sst [smem:[#allocation17_spill]] %s1819_s17  ;;  %p1490_p4 = por %p61_p2, %p60_p1 }
  0x15   : > { %s48_s20 = ssub.s32 %s1378_s13, %s1819_s17  ;;  %p197_p6 = scmp.eq.s32.totalorder %s1478_s15, 1 }
  0x16   : > { %p51_p7 = scmp.eq.s32.totalorder %s48_s20, 0  ;;  %p1498_p8 = por %p67_p5, %p66_p3 }
  0x17   : > { %p1502_p9 = por %p197_p6, %p60_p1  ;;  %p203_p10 = scmp.eq.s32.totalorder %s1790_s16, 1 }
  0x18   : > { %s1509_s23 = scalar_select %p51_p7, %s1370_s11, %s53_s18  }
  0x19   : > { %p1511_p11 = por %p203_p10, %p66_p3  ;;  %p1128_p13 = scmp.lt.s32.totalorder %s1382_s14, 2 }
  0x1a   : > { %1802 = sst [smem:[#allocation18_spill]] %s1509_s23  ;;  %s322_s25 = sand.u32 1, %s1370_s11  }
  0x1b   : > { %s1053_s26 = sshll.u32 %s322_s25, 6  ;;  %s1090_s27 = sshll.u32 %s1378_s13, 10 }
  0x1c   : > { %s1804_s0 = sld [smem:[#allocation19_spill]]  ;;  %s326_s17 = scalar_lea.vmem [#allocation2], %s1053_s26 }
  0x1d   : > { %s335_s30 = sshll.u32 %s326_s17, 4  ;;  %p1524_p0 = pnand %p1128_p13, %p1490_p4  ;;  %s336_s30 = int_to_ptr.vmem [resolvable:$true] %s335_s30 }
  0x1e   : > { %p1056_p1 = scmp.ge.s32.totalorder %s1382_s14, 1  ;;  %s323_s16 = scalar_lea.sflag [#allocation3], %s322_s25 }
  0x1f   : > { %p1190_p2 = pneg %p1524_p0  ;;  %s1201_s23 = scalar_lea.vmem %s336_s30, 1024 }
  0x20   : > { %p1202_p3 = scmp.ne.s32.totalorder %s336_s30, %s1201_s23  ;;  %s1384_s13 = smov [#allocation2]  }
  0x21   : > { %s1206_s28 = sshll.u32 %s1384_s13, 4  ;;  %s1207_s28 = int_to_ptr.vmem [resolvable:$false] %s1206_s28 }
  0x22   : > { %s334_s20 = scalar_lea.hbm %s1804_s0, %s1090_s27  ;;  %p1204_p5 = pnand %p1202_p3, %p1190_p2 }
  0x23   : > { %s1208_s26 = scalar_lea.vmem %s1207_s28, 2048  ;;  %p1209_p7 = scmp.lt.s32.totalorder %s336_s30, %s1207_s28 }
  0x24   : > { %p1205_p6 = pneg %p1204_p5  ;;  %p1210_p10 = scmp.lt.s32.totalorder %s1208_s26, %s1201_s23 }
  0x26   : > { %p1211_p12 = por %p1210_p10, %p1209_p7 }
  0x28   : > { %p1212_p4 = pnand %p1211_p12, %p1205_p6 }
  0x2a   : > { %1215 = shalt.err (!%p1212_p4)
}
  0x2b   : > { %s1385_s17 = smov 256   ;;  %s1386_s19 = smov 16  }
  0x2c   : > { %1114 = dma.hbm_to_vmem [thread:$0]  (!%p1524_p0), %s334_s20, 1024, %s336_s30, %s323_s16, %s1385_s17, %s1385_s17, %s1386_s19  }
  0x2d   : > { %p343_p13 = scmp.lt.s32.totalorder %s1382_s14, 3 }
  0x2f   : > { %p344_p2 = pnand %p1056_p1, %p343_p13 }
  0x30   : > { %s1537_s13 = sand.u32 (!%p344_p2), 1, %s1366_s10  }
  0x31   : > { %347 = sbr.rel (%p344_p2) target bundleno = 501 (0x1f5), region = 44  ;;  %s1057_s23 = sshll.u32 (!%p344_p2), %s1537_s13, 6 }
  0x32   : > { %s350_s25 = scalar_lea.sflag (!%p344_p2), [#allocation3], %s1537_s13  ;;  %s353_s27 = scalar_lea.vmem (!%p344_p2), [#allocation2], %s1057_s23 }
  0x36   : > { %1345 = dma.done.wait (%p1498_p8), %s350_s25, 1024  }
  0x37   : > { %1347 = vsyncadd (%p1498_p8), %s350_s25, 4294966272  ;;  %v1387_v0 = vmov 0.0   ;;  %v1388_v1 = vmov 0   ;;  %v415_v2 = vld [vmem:[%s353_s27 + $0x38] sm:$0xff]  ;;  %v414_v3 = vld [vmem:[%s353_s27 + $0x30] sm:$0xff]  ;;  %s1806_s2 = sld [smem:[#allocation21_spill]] }
  0x38   : > { %501 = vmatprep.mubr.f32.mxu1 %v1387_v0  ;;  %1187 = vset.pattern.permute.xlu1 %v1388_v1  ;;  %v413_v4 = vld [vmem:[%s353_s27 + $0x28] sm:$0xff]  ;;  %v412_v5 = vld [vmem:[%s353_s27 + $0x20] sm:$0xff]  ;;  %v411_v6 = vld [vmem:[%s353_s27 + $0x18] sm:$0xff]  ;;  %s1807_s1 = sld [smem:[#allocation20_spill]]  ;;  %vm430_vm0 = vcmask 261120   ;;  %s1579_s29 = sshll.u32 %s1537_s13, 5 }
  0x39   : > { %1186 = vset.pattern.permute.xlu0 %v1388_v1  ;;  %722 = vmatprep.mubr.f32.mxu0 %v1387_v0  ;;  %v410_v7 = vld [vmem:[%s353_s27 + $0x10] sm:$0xff]  ;;  %v409_v8 = vld [vmem:[%s353_s27 + $0x8] sm:$0xff]  ;;  %v408_v11 = vld [vmem:[%s353_s27] sm:$0xff]  ;;  %s1582_s20 = scalar_lea.vmem [#allocation5], %s1579_s29  ;;  %s1060_s18 = sshll.u32 %s1537_s13, 4  ;;  %vm645_vm1 = vcmask 130048  }
  0x3a   : > { %461 = vmatprep.subr.mxu1 %v415_v2  ;;  %v543_v10 = vld [vmem:[%s1782_s4 + $0x8] sm:$0xff]  ;;  %v542_v14 = vld [vmem:[%s1782_s4] sm:$0xff]  ;;  %s1588_s28 = scalar_lea.vmem [#allocation8], %s1060_s18  ;;  %s1593_s26 = scalar_lea.vmem [#allocation6], %s1579_s29  ;;  %v643_v50 = vld [vmem:[%s1783_s5 + $0x10] sm:$0xff] }
  0x3b   : > { %462 = vmatpush1.msra.mxu1 %v414_v3  ;;  %551 = vperm.xlu0 %1186, %v543_v10   ;;  %v540_v16 = vld [vmem:[%s1781_s3] sm:$0xff]  ;;  %v541_v17 = vld [vmem:[%s1781_s3 + $0x8] sm:$0xff]  ;;  %v644_v51 = vld [vmem:[%s1783_s5 + $0x18] sm:$0xff]  ;;  %s806_s18 = sshll.u32 %s1582_s20, 4  ;;  %s842_s17 = sshll.u32 %s1588_s28, 4  ;;  %s1618_s18 = int_to_ptr.vmem [resolvable:$true] %s806_s18  ;;  %s1620_s17 = int_to_ptr.vmem [resolvable:$true] %s842_s17 }
  0x3c   : > { %463 = vmatprep.subr.mxu1 %v413_v4  ;;  %v641_v48 = vld [vmem:[%s1783_s5] sm:$0xff]  ;;  %v642_v49 = vld [vmem:[%s1783_s5 + $0x8] sm:$0xff]  ;;  %s824_s19 = sshll.u32 %s1593_s26, 4  ;;  %s780_s23 = sand.u32 1, %s1478_s15   ;;  %s1622_s19 = int_to_ptr.vmem [resolvable:$true] %s824_s19 }
  0x3d   : > { %464 = vmatpush1.msra.mxu1 %v412_v5  ;;  %v418_v9 = vld [vmem:[%s1806_s2] sm:$0xff]  ;;  %v419_v13 = vld [vmem:[%s1806_s2 + $0x8] sm:$0xff]  ;;  %s1626_s25 = sshll.u32 %s1374_s12, 9 }
  0x3e   : > { %465 = vmatprep.subr.mxu1 %v411_v6  ;;  %422 = vperm.xlu1 %1187, %v418_v9   ;;  %v416_v12 = vld [vmem:[%s1807_s1] sm:$0xff]  ;;  %v417_v15 = vld [vmem:[%s1807_s1 + $0x8] sm:$0xff]  ;;  %s1632_s16 = scalar_lea.hbm %s1785_s7, %s1626_s25 }
  0x3f   : > { %466 = vmatpush1.msra.mxu1 %v410_v7  ;;  %546 = vperm.xlu0 %1186, %v542_v14  }
  0x40   : > { %467 = vmatprep.subr.mxu1 %v409_v8 }
  0x41   : > { %468 = vmatpush1.msra.mxu1 %v408_v11 }
  0x42   : > { %1062 = vmatmul.mubr.msk.f32.vlgmr.msra.gmra.mxu1 %vm430_vm0, %v416_v12  ;;  %584 = vmatprep.subr.mxu1 %v415_v2 }
  0x43   : > { %585 = vmatpush1.msra.mxu1 %v414_v3  ;;  %507 = vmatprep.mubr.f32.mxu1 %v1387_v0 }
  0x44   : > { %586 = vmatprep.subr.mxu1 %v413_v4  ;;  %427 = vperm.xlu1 %1187, %v419_v13  }
  0x45   : > { %587 = vmatpush1.msra.mxu1 %v412_v5 }
  0x46   : > { %1063 = vmatmul.mubr.msk.f32.gmra.mxu1 %vm430_vm0, %v417_v15  ;;  %588 = vmatprep.subr.mxu1 %v411_v6 }
  0x47   : > { %589 = vmatpush1.msra.mxu1 %v410_v7  ;;  %624 = vmatprep.mubr.f32.mxu1 %v1387_v0 }
  0x48   : > { %590 = vmatprep.subr.mxu1 %v409_v8 }
  0x49   : > { %591 = vmatpush1.msra.mxu1 %v408_v11 }
  0x4a   : > { %1066 = vmatmul.mubr.msk.f32.vlgmr.msra.gmra.mxu1 %vm430_vm0, %v540_v16 }
  0x4b   : > { %630 = vmatprep.mubr.f32.mxu1 %v1387_v0 }
  0x4e   : > { %1067 = vmatmul.mubr.msk.f32.gmra.mxu1 %vm430_vm0, %v541_v17 }
  0xb6   : > { %v552_v20 = vpop.permute.xlu0 %551 }
  0xb9   : > { %v423_v18 = vpop.permute.xlu1 %422 }
  0xba   : > { %v547_v30 = vpop.permute.xlu0 %546 }
  0xbf   : > { %v428_v23 = vpop.permute.xlu1 %427 }
 0x102   : > { %v503_v19 = vpop.f32.mrf.mxu1 }
 0x103   : > { %v504_v21 = vadd.f32 %v503_v19, %v423_v18 }
 0x104   : > { %v505_v22 = vpop.f32.mrf.mxu1 }
 0x105   : > { %v514_v24 = vmax.f32 %v504_v21, 0.0  ;;  %v506_v25 = vadd.f32 %v505_v22, %v423_v18 }
 0x106   : > { %v509_v26 = vpop.f32.mrf.mxu1 }
 0x107   : > { %518 = vst [vmem:[%s1582_s20] sm:$0xff] %v514_v24  ;;  %v515_v27 = vmax.f32 %v506_v25, 0.0  ;;  %v510_v28 = vadd.f32 %v509_v26, %v428_v23  ;;  %v522_v31 = vmul.f32 0.5, %v514_v24 }
 0x108   : > { %v511_v29 = vpop.f32.mrf.mxu1 }
 0x109   : > { %519 = vst [vmem:[%s1582_s20 + $0x8] sm:$0xff] %v515_v27  ;;  %v523_v32 = vmul.f32 0.5, %v515_v27  ;;  %v516_v33 = vmax.f32 %v510_v28, 0.0  ;;  %v512_v34 = vadd.f32 %v511_v29, %v428_v23 }
 0x10a   : > { %v626_v35 = vpop.f32.mrf.mxu1 }
 0x10b   : > { %v1091_v36 = vpack.c.bf16 %v523_v32, %v522_v31  ;;  %520 = vst [vmem:[%s1582_s20 + $0x10] sm:$0xff] %v516_v33  ;;  %v517_v37 = vmax.f32 %v512_v34, 0.0  ;;  %v627_v38 = vadd.f32 %v626_v35, %v547_v30  ;;  %v524_v40 = vmul.f32 0.5, %v516_v33 }
 0x10c   : > { %v628_v39 = vpop.f32.mrf.mxu1 }
 0x10d   : > { %538 = vst [vmem:[%s1588_s28] sm:$0xff] %v1091_v36  ;;  %521 = vst [vmem:[%s1582_s20 + $0x18] sm:$0xff] %v517_v37  ;;  %v525_v41 = vmul.f32 0.5, %v517_v37  ;;  %v629_v42 = vadd.f32 %v628_v39, %v547_v30  ;;  %s1634_s20 = scalar_lea.sflag [#allocation7], %s780_s23 }
 0x10e   : > { %637 = vst [vmem:[%s1593_s26] sm:$0xff] %v627_v38  ;;  %v632_v43 = vpop.f32.mrf.mxu1 }
 0x10f   : > { %v1092_v44 = vpack.c.bf16 %v525_v41, %v524_v40  ;;  %638 = vst [vmem:[%s1593_s26 + $0x8] sm:$0xff] %v629_v42  ;;  %v633_v45 = vadd.f32 %v632_v43, %v552_v20 }
 0x110   : > { %v634_v46 = vpop.f32.mrf.mxu1 }
 0x111   : > { %539 = vst [vmem:[%s1588_s28 + $0x8] sm:$0xff] %v1092_v44  ;;  %639 = vst [vmem:[%s1593_s26 + $0x10] sm:$0xff] %v633_v45  ;;  %v635_v47 = vadd.f32 %v634_v46, %v552_v20  ;;  %s1216_s28 = scalar_lea.vmem %s1622_s19, 512 }
 0x112   : > { %p1217_p8 = scmp.ne.s32.totalorder %s1622_s19, %s1216_s28 }
 0x113   : > { %640 = vst [vmem:[%s1593_s26 + $0x18] sm:$0xff] %v635_v47  ;;  %686 = vmatprep.subr.mxu0 %v635_v47  ;;  %s1389_s26 = smov [#allocation6]  }
 0x114   : > { %687 = vmatpush1.msra.mxu0 %v633_v45  ;;  %p1218_p12 = pnand %p1217_p8, %p1502_p9  ;;  %s1220_s21 = sshll.u32 %s1389_s26, 4  ;;  %s1221_s21 = int_to_ptr.vmem [resolvable:$false] %s1220_s21 }
 0x115   : > { %688 = vmatprep.subr.mxu0 %v629_v42  ;;  %s1222_s0 = scalar_lea.vmem %s1221_s21, 1024  ;;  %p1223_p1 = scmp.lt.s32.totalorder %s1622_s19, %s1221_s21 }
 0x116   : > { %689 = vmatpush1.msra.mxu0 %v627_v38  ;;  %p1219_p0 = pneg %p1218_p12  ;;  %p1224_p3 = scmp.lt.s32.totalorder %s1222_s0, %s1216_s28 }
 0x117   : > { %1068 = vmatmul.mubr.msk.f32.vlgmr.msra.gmra.mxu0 %vm645_vm1, %v641_v48 }
 0x118   : > { %728 = vmatprep.mubr.f32.mxu0 %v1387_v0  ;;  %p1225_p5 = por %p1224_p3, %p1223_p1 }
 0x11a   : > { %p1226_p6 = pnand %p1225_p5, %p1219_p0 }
 0x11b   : > { %1069 = vmatmul.mubr.msk.f32.gmra.mxu0 %vm645_vm1, %v642_v49 }
 0x11c   : > { %734 = vmatprep.mubr.f32.mxu0 %v1387_v0 }
 0x11f   : > { %1070 = vmatmul.mubr.msk.f32.gmra.mxu0 %vm645_vm1, %v643_v50 }
 0x120   : > { %740 = vmatprep.mubr.f32.mxu0 %v1387_v0 }
 0x123   : > { %1071 = vmatmul.mubr.msk.f32.gmra.mxu0 %vm645_vm1, %v644_v51 }
 0x124   : > { %1229 = shalt.err (!%p1226_p6)
}
 0x125   : > { %s1230_s15 = scalar_lea.hbm %s1632_s16, 512  ;;  %s1234_s30 = scalar_lea.hbm %s1785_s7, 1024 }
 0x126   : > { %p1231_p7 = scmp.ne.s32.totalorder %s1632_s16, %s1230_s15  ;;  %p1235_p13 = scmp.lt.s32.totalorder %s1632_s16, %s1785_s7 }
 0x127   : > { %p1236_p2 = scmp.lt.s32.totalorder %s1234_s30, %s1230_s15 }
 0x128   : > { %p1232_p10 = pnand %p1231_p7, %p1502_p9 }
 0x129   : > { %p1237_p8 = por %p1236_p2, %p1235_p13 }
 0x12a   : > { %p1233_p4 = pneg %p1232_p10 }
 0x12c   : > { %p1238_p12 = pnand %p1237_p8, %p1233_p4 }
 0x12e   : > { %1241 = shalt.err (!%p1238_p12)
}
 0x12f   : > { %s1792_s0 = smov 256   ;;  %s1391_s28 = smov 16  }
 0x130   : > { %1104 = dma.vmem_to_hbm [thread:$0]  (%p1502_p9), %s1622_s19, 512, %s1632_s16, %s1634_s20, %s1792_s0, %s1792_s0, %s1391_s28  }
 0x131   : > { %s1664_s15 = scalar_lea.hbm %s1784_s6, %s1626_s25  ;;  %s776_s23 = scalar_lea.sflag [#allocation4], %s1537_s13 }
 0x132   : > { %s1242_s27 = scalar_lea.vmem %s1618_s18, 512  ;;  %s1392_s30 = smov [#allocation5]  }
 0x133   : > { %p1243_p0 = scmp.ne.s32.totalorder %s1618_s18, %s1242_s27  ;;  %s1246_s26 = sshll.u32 %s1392_s30, 4  ;;  %s1247_s26 = int_to_ptr.vmem [resolvable:$false] %s1246_s26 }
 0x134   : > { %s1248_s2 = scalar_lea.vmem %s1247_s26, 1024  ;;  %p1249_p5 = scmp.lt.s32.totalorder %s1618_s18, %s1247_s26 }
 0x135   : > { %p1244_p1 = pnand %p1243_p0, %p1502_p9  ;;  %p1250_p6 = scmp.lt.s32.totalorder %s1248_s2, %s1242_s27 }
 0x137   : > { %p1245_p3 = pneg %p1244_p1  ;;  %p1251_p7 = por %p1250_p6, %p1249_p5 }
 0x139   : > { %p1252_p10 = pnand %p1251_p7, %p1245_p3 }
 0x13b   : > { %1255 = shalt.err (!%p1252_p10)
}
 0x13c   : > { %s1256_s19 = scalar_lea.hbm %s1664_s15, 512  ;;  %s1260_s21 = scalar_lea.hbm %s1784_s6, 1024 }
 0x13d   : > { %p1257_p4 = scmp.ne.s32.totalorder %s1664_s15, %s1256_s19  ;;  %p1261_p8 = scmp.lt.s32.totalorder %s1664_s15, %s1784_s6 }
 0x13e   : > { %p1262_p12 = scmp.lt.s32.totalorder %s1260_s21, %s1256_s19 }
 0x13f   : > { %p1258_p13 = pnand %p1257_p4, %p1502_p9 }
 0x140   : > { %p1263_p0 = por %p1262_p12, %p1261_p8 }
 0x141   : > { %p1259_p2 = pneg %p1258_p13 }
 0x143   : > { %p1264_p1 = pnand %p1263_p0, %p1259_p2 }
 0x145   : > { %1267 = shalt.err (!%p1264_p1)
}
 0x146   : > { %s1808_s2 = smov 256   ;;  %s1099_s27 = sshll.u32 %s1374_s12, 8 }
 0x147   : > { %1103 = dma.vmem_to_hbm [thread:$0]  (%p1502_p9), %s1618_s18, 512, %s1664_s15, %s776_s23, %s1808_s2, %s1808_s2, %s1391_s28  }
 0x148   : > { %s1694_s19 = scalar_lea.hbm %s1786_s8, %s1099_s27  ;;  %s1268_s16 = scalar_lea.vmem %s1620_s17, 256 }
 0x149   : > { %p1269_p3 = scmp.ne.s32.totalorder %s1620_s17, %s1268_s16  ;;  %s1393_s1 = smov [#allocation8]  }
 0x14a   : > { %s1272_s21 = sshll.u32 %s1393_s1, 4  ;;  %s1273_s21 = int_to_ptr.vmem [resolvable:$false] %s1272_s21 }
 0x14b   : > { %p1270_p5 = pnand %p1269_p3, %p1502_p9  ;;  %s1274_s30 = scalar_lea.vmem %s1273_s21, 512 }
 0x14c   : > { %p1275_p7 = scmp.lt.s32.totalorder %s1620_s17, %s1273_s21  ;;  %p1276_p10 = scmp.lt.s32.totalorder %s1274_s30, %s1268_s16 }
 0x14d   : > { %p1271_p6 = pneg %p1270_p5 }
 0x14e   : > { %p1277_p4 = por %p1276_p10, %p1275_p7 }
 0x150   : > { %p1278_p13 = pnand %p1277_p4, %p1271_p6 }
 0x152   : > { %1281 = shalt.err (!%p1278_p13)
}
 0x153   : > { %s1282_s12 = scalar_lea.hbm %s1694_s19, 256  ;;  %s1286_s15 = scalar_lea.hbm %s1786_s8, 512 }
 0x154   : > { %p1283_p2 = scmp.ne.s32.totalorder %s1694_s19, %s1282_s12  ;;  %p1287_p0 = scmp.lt.s32.totalorder %s1694_s19, %s1786_s8 }
 0x155   : > { %p1288_p1 = scmp.lt.s32.totalorder %s1286_s15, %s1282_s12 }
 0x156   : > { %p1284_p8 = pnand %p1283_p2, %p1502_p9 }
 0x157   : > { %p1289_p3 = por %p1288_p1, %p1287_p0 }
 0x158   : > { %p1285_p12 = pneg %p1284_p8 }
 0x15a   : > { %p1290_p5 = pnand %p1289_p3, %p1285_p12 }
 0x15c   : > { %1293 = shalt.err (!%p1290_p5)
}
 0x15d   : > { %s1394_s27 = smov 128   ;;  %s1395_s0 = smov 8  }
 0x15e   : > { %1105 = dma.vmem_to_hbm [thread:$0]  (%p1502_p9), %s1620_s17, 256, %s1694_s19, %s1634_s20, %s1394_s27, %s1394_s27, %s1395_s0  }
 0x15f   : > { %s402_s26 = scalar_lea.vmem [#allocation9], %s1579_s29  ;;  %s1727_s20 = scalar_lea.hbm %s1787_s9, %s1626_s25 }
 0x160   : > { %s860_s16 = sshll.u32 %s402_s26, 4  ;;  %s791_s19 = scalar_lea.sflag [#allocation10], %s1537_s13  ;;  %s1721_s16 = int_to_ptr.vmem [resolvable:$true] %s860_s16 }
 0x161   : > { %s1294_s1 = scalar_lea.vmem %s1721_s16, 512  ;;  %s1396_s21 = smov [#allocation9]  }
 0x162   : > { %p1295_p6 = scmp.ne.s32.totalorder %s1721_s16, %s1294_s1  ;;  %s1298_s30 = sshll.u32 %s1396_s21, 4  ;;  %s1299_s30 = int_to_ptr.vmem [resolvable:$false] %s1298_s30 }
 0x163   : > { %s1300_s12 = scalar_lea.vmem %s1299_s30, 1024  ;;  %p1301_p4 = scmp.lt.s32.totalorder %s1721_s16, %s1299_s30 }
 0x164   : > { %p1296_p7 = pnand %p1295_p6, %p1502_p9  ;;  %p1302_p13 = scmp.lt.s32.totalorder %s1300_s12, %s1294_s1 }
 0x166   : > { %p1297_p10 = pneg %p1296_p7  ;;  %p1303_p2 = por %p1302_p13, %p1301_p4 }
 0x168   : > { %p1304_p8 = pnand %p1303_p2, %p1297_p10 }
 0x1d7   : > { %v724_v52 = vpop.f32.mrf.mxu0 }
 0x1d9   : > { %v726_v53 = vpop.f32.mrf.mxu0 }
 0x1da   : > { %v1093_v54 = vpack.c.bf16 %v726_v53, %v724_v52 }
 0x1db   : > { %v730_v55 = vpop.f32.mrf.mxu0 }
 0x1dc   : > { %771 = vst [vmem:[%s402_s26] sm:$0xff] %v1093_v54 }
 0x1dd   : > { %v732_v56 = vpop.f32.mrf.mxu0 }
 0x1de   : > { %v1094_v57 = vpack.c.bf16 %v732_v56, %v730_v55 }
 0x1df   : > { %v736_v58 = vpop.f32.mrf.mxu0 }
 0x1e0   : > { %772 = vst [vmem:[%s402_s26 + $0x8] sm:$0xff] %v1094_v57 }
 0x1e1   : > { %v738_v59 = vpop.f32.mrf.mxu0 }
 0x1e2   : > { %v1095_v60 = vpack.c.bf16 %v738_v59, %v736_v58 }
 0x1e3   : > { %v742_v61 = vpop.f32.mrf.mxu0 }
 0x1e4   : > { %773 = vst [vmem:[%s402_s26 + $0x10] sm:$0xff] %v1095_v60 }
 0x1e5   : > { %v744_v62 = vpop.f32.mrf.mxu0 }
 0x1e6   : > { %v1096_v63 = vpack.c.bf16 %v744_v62, %v742_v61 }
 0x1e8   : > { %774 = vst [vmem:[%s402_s26 + $0x18] sm:$0xff] %v1096_v63 }
 0x1e9   : > { %1307 = shalt.err (!%p1304_p8)
}
 0x1ea   : > { %s1308_s25 = scalar_lea.hbm %s1727_s20, 512  ;;  %s1312_s28 = scalar_lea.hbm %s1787_s9, 1024 }
 0x1eb   : > { %p1309_p12 = scmp.ne.s32.totalorder %s1727_s20, %s1308_s25  ;;  %p1313_p3 = scmp.lt.s32.totalorder %s1727_s20, %s1787_s9 }
 0x1ec   : > { %p1314_p5 = scmp.lt.s32.totalorder %s1312_s28, %s1308_s25 }
 0x1ed   : > { %p1310_p0 = pnand %p1309_p12, %p1502_p9 }
 0x1ee   : > { %p1315_p6 = por %p1314_p5, %p1313_p3 }
 0x1ef   : > { %p1311_p1 = pneg %p1310_p0 }
 0x1f1   : > { %p1316_p7 = pnand %p1315_p6, %p1311_p1 }
 0x1f3   : > { %1319 = shalt.err (!%p1316_p7)
}
 0x1f4   : > { %1106 = dma.vmem_to_hbm [thread:$0]  (%p1502_p9), %s1721_s16, 512, %s1727_s20, %s791_s19, %s1394_s27, %s1394_s27, %s1395_s0  }
 0x1f5 PF: > { %s1809_s2 = sld [smem:[#allocation15_spill]]  ;;  %p1810_p10 = scmp.ge.s32.totalorder %s1382_s14, 2 }
 0x1f7   : > { %p1116_p4 = pnand %p1810_p10, %p1511_p11 }
 0x1f9   : > { %p1117_p13 = pneg %p1116_p4 }
 0x1fb   : > { %s875_s26 = sand.u32 1, %s1809_s2  }
 0x1fc   : > { %s876_s29 = scalar_lea.sflag [#allocation4], %s875_s26 }
 0x1fd   : > { %1349 = dma.done.wait (%p1117_p13), %s876_s29, 512  }
 0x1fe   : > { %1351 = vsyncadd (%p1117_p13), %s876_s29, 4294966784  ;;  %s1811_s22 = sadd.s32 4294967294, %s1382_s14  }
 0x1ff   : > { %s884_s17 = sand.u32 1, %s1811_s22  }
 0x200   : > { %s885_s1 = scalar_lea.sflag [#allocation7], %s884_s17 }
 0x201   : > { %1353 = dma.done.wait (%p1117_p13), %s885_s1, 768  }
 0x202   : > { %1355 = vsyncadd (%p1117_p13), %s885_s1, 4294966528  ;;  %s903_s21 = scalar_lea.sflag [#allocation10], %s875_s26 }
 0x203   : > { %1357 = dma.done.wait (%p1117_p13), %s903_s21, 512  }
 0x204   : > { %1359 = vsyncadd (%p1117_p13), %s903_s21, 4294966784  ;;  %s32_s14 = sadd.s32 1, %s1382_s14   ;;  %s1812_s24 = sld [smem:[#allocation18_spill]] }
 0x205   : > { %p29_p9 = scmp.ge.s32.totalorder %s32_s14, 4   ;;  %s1813_s12 = sld [smem:[#allocation16_spill]] }
 0x206   : > { %s1814_s13 = sld [smem:[#allocation17_spill]]  ;;  %s1815_s30 = smov %s1366_s10 }
 0x207   : > { %s1816_s10 = smov %s1370_s11  ;;  %31 = sbr.rel (!%p29_p9) target bundleno = 14 (0xe), region = 138 }
 0x20a   : > { %s1817_s11 = smov %s1812_s24 }
 0x20c   :  { %908 = vsyncpa [#allocation3], 1 }
 0x20d   :  { %910 = vsyncpa [#allocation3 + $0x1], 1 }
 0x20e   :  { %911 = vsyncpa [#allocation4], 1 }
 0x20f   :  { %913 = vsyncpa [#allocation4 + $0x1], 1 }
 0x210   :  { %914 = vsyncpa [#allocation7], 1 }
 0x211   :  { %916 = vsyncpa [#allocation7 + $0x1], 1 }
 0x212   :  { %917 = vsyncpa [#allocation10], 1 }
 0x213   :  { %919 = vsyncpa [#allocation10 + $0x1], 1 }

</bundles_post_ra>
